<compile_context>
chip_gen: v6e
topology: v6e:2x2x1
jax: 0.10.0
libtpu: 0.0.40
codegen_flags: <defaults>
</compile_context>

<pallas_src>
import functools

import jax
import jax.numpy as jnp
from jax.experimental import pallas as pl
from jax.experimental.pallas import tpu as pltpu


def _round_up(x, m):
    return ((x + m - 1) // m) * m


def _contrastive_loss_kernel(anchor_ref, other_ref, labels_ref, out_ref, *,
                             margin_s, margin_d, true_batch, block_rows):
    pid = pl.program_id(0)

    a = anchor_ref[...]                              # (TB, D)
    b = other_ref[...]                               # (TB, D)
    if a.dtype != jnp.float32:
        a = a.astype(jnp.float32)
        b = b.astype(jnp.float32)
    lbl = labels_ref[...]                            # (TB, 1) float32

    # One pass over the loaded tiles feeds all three row reductions.
    dot = jnp.sum(a * b, axis=-1, keepdims=True)     # (TB, 1)
    naa = jnp.sum(a * a, axis=-1, keepdims=True)     # (TB, 1)
    nbb = jnp.sum(b * b, axis=-1, keepdims=True)     # (TB, 1)

    # F.cosine_similarity eps clamp: max(sqrt(x), 1e-8) == sqrt(max(x, 1e-16)).
    # Single rsqrt (EUP slot) replaces two sqrts and a divide.
    eps2 = jnp.float32(1e-16)
    inv_denom = jax.lax.rsqrt(jnp.maximum(naa, eps2) * jnp.maximum(nbb, eps2))
    sims = (dot * inv_denom + 1.0) * 0.5             # (TB, 1)

    same = lbl * jnp.square(jnp.maximum(jnp.float32(margin_s) - sims, 0.0))
    diff = (1.0 - lbl) * jnp.square(jnp.maximum(sims - jnp.float32(margin_d), 0.0))
    losses = 0.5 * (same + diff)                     # (TB, 1)

    # Mask rows of the (possibly ragged, unpadded) last tile. MUST stay a
    # select (not a multiply) so garbage/NaN rows cannot poison the sum.
    row = jax.lax.broadcasted_iota(jnp.int32, losses.shape, 0)
    valid = (pid * block_rows + row) < true_batch
    losses = jnp.where(valid, losses, 0.0)

    out_ref[...] = jnp.sum(losses, keepdims=True)    # (1, 1)


def modified_contrastive_loss(anchor, other, labels,
                              margin_s=0.5, margin_d=0.5, block_rows=None):
    """Pallas wrapper. anchor/other: (B, D) (f32 or bf16); labels: (B,) of {0,1}."""
    B, D = anchor.shape
    itemsize = jnp.dtype(anchor.dtype).itemsize
    # Native sublane packing: 8 for 4-byte, 16 for bf16, 32 for int8/fp8.
    sublane = max(8, 32 // itemsize)

    # Generation-aware VMEM capacity (64 MiB on v7x, 128 MiB on v5e/v6e).
    vmem_cap = 64 * 1024 * 1024
    try:
        vmem_cap = int(getattr(pltpu.get_tpu_info(), "vmem_capacity_bytes",
                               vmem_cap))
    except Exception:
        pass

    if block_rows is None:
        # Per tile row we need:
        #  - 2 inputs x 2 pipeline buffers of the raw dtype,
        #  - up to ~3 f32-wide in-kernel temporaries per input element
        #    (upcasts / mul->reduce intermediates),
        #  - the (TB,1) labels block lane-padded to 128 x f32 x 2 buffers.
        per_row = D * (2 * 2 * itemsize + 3 * 4) + 2 * 128 * 4
        budget = int(vmem_cap * 0.45)
        tb = (budget // per_row) // sublane * sublane
        tb = max(sublane, min(tb, 4096))
        # Keep >= 2 grid tiles whenever B allows, so the "parallel" batch axis
        # can split across both TensorCores on v7x megacore.
        tb = min(tb, max(sublane, _round_up((B + 1) // 2, sublane)))
        block_rows = tb
    block_rows = max(sublane, _round_up(block_rows, sublane))
    block_rows = min(block_rows, _round_up(B, sublane))

    num_tiles = pl.cdiv(B, block_rows)

    # Labels are tiny (B floats): reshaping them costs nothing vs. the B*D reads.
    labels_col = labels.astype(jnp.float32).reshape(B, 1)

    kernel = functools.partial(
        _contrastive_loss_kernel,
        margin_s=float(margin_s), margin_d=float(margin_d),
        true_batch=B, block_rows=block_rows)

    vmem_limit = max(32 * 1024 * 1024, int(vmem_cap * 0.6))

    partial_sums = pl.pallas_call(
        kernel,
        out_shape=jax.ShapeDtypeStruct((num_tiles, 1), jnp.float32),
        grid_spec=pltpu.PrefetchScalarGridSpec(
            num_scalar_prefetch=0,
            grid=(num_tiles,),
            in_specs=[
                pl.BlockSpec((block_rows, D), lambda i: (i, 0)),
                pl.BlockSpec((block_rows, D), lambda i: (i, 0)),
                pl.BlockSpec((block_rows, 1), lambda i: (i, 0)),
            ],
            out_specs=pl.BlockSpec((1, 1), lambda i: (i, 0)),
        ),
        compiler_params=pltpu.CompilerParams(
            dimension_semantics=("parallel",),
            vmem_limit_bytes=vmem_limit),
    )(anchor, other, labels_col)

    # Mean over the TRUE batch (invalid rows were masked to zero in-kernel).
    return jnp.sum(partial_sums) / jnp.float32(B)


def _reference(anchor, other, labels, margin_s=0.5, margin_d=0.5):
    """Pure-JAX reference mirroring the PyTorch forward."""
    eps = 1e-8
    dot = jnp.sum(anchor * other, axis=1)
    na = jnp.maximum(jnp.linalg.norm(anchor, axis=1), eps)
    nb = jnp.maximum(jnp.linalg.norm(other, axis=1), eps)
    sims = (dot / (na * nb) + 1.0) / 2.0
    lbl = labels.astype(jnp.float32)
    same = lbl * jnp.square(jax.nn.relu(margin_s - sims))
    diff = (1.0 - lbl) * jnp.square(jax.nn.relu(sims - margin_d))
    return jnp.mean(0.5 * (same + diff))


if __name__ == "__main__":
    # Case 1: toy shape (B=8, D=32), auto tile sizing, single tile.
    k1, k2, k3 = jax.random.split(jax.random.PRNGKey(0), 3)
    B, D = 8, 32
    anchor = jax.random.normal(k1, (B, D), dtype=jnp.float32)
    other = jax.random.normal(k2, (B, D), dtype=jnp.float32)
    labels = jax.random.bernoulli(k3, 0.5, (B,)).astype(jnp.int32)

    loss = modified_contrastive_loss(anchor, other, labels)
    jax.block_until_ready(loss)
    ref = _reference(anchor, other, labels)
    assert jnp.allclose(loss, ref, atol=1e-6, rtol=1e-5), (loss, ref)

    # Case 2: ragged batch + non-128 feature dim, forced multi-tile grid
    # (exercises the unpadded ragged last block + in-kernel row masking).
    k4, k5, k6 = jax.random.split(jax.random.PRNGKey(1), 3)
    B2, D2 = 50, 160
    anchor2 = jax.random.normal(k4, (B2, D2), dtype=jnp.float32)
    other2 = jax.random.normal(k5, (B2, D2), dtype=jnp.float32)
    labels2 = jax.random.bernoulli(k6, 0.5, (B2,)).astype(jnp.int32)

    loss2 = modified_contrastive_loss(anchor2, other2, labels2, block_rows=16)
    jax.block_until_ready(loss2)
    ref2 = _reference(anchor2, other2, labels2)
    assert jnp.allclose(loss2, ref2, atol=1e-6, rtol=1e-5), (loss2, ref2)

    # Case 3: lane-aligned D, auto sizing with the ">=2 tiles" megacore cap
    # (B=40 -> block_rows=24 -> 2-tile grid, ragged last tile).
    k7, k8, k9 = jax.random.split(jax.random.PRNGKey(2), 3)
    B3, D3 = 40, 128
    anchor3 = jax.random.normal(k7, (B3, D3), dtype=jnp.float32)
    other3 = jax.random.normal(k8, (B3, D3), dtype=jnp.float32)
    labels3 = jax.random.bernoulli(k9, 0.5, (B3,)).astype(jnp.int32)

    loss3 = modified_contrastive_loss(anchor3, other3, labels3)
    jax.block_until_ready(loss3)
    ref3 = _reference(anchor3, other3, labels3)
    assert jnp.allclose(loss3, ref3, atol=1e-6, rtol=1e-5), (loss3, ref3)

    print("KERNEL_OK")
</pallas_src>

<mosaic_0001>
module attributes {stable_mosaic.version = 11 : i64} {
  func.func @_contrastive_loss_kernel(%arg0: i32, %arg1: memref<8x32xf32, #tpu.memory_space<vmem>>, %arg2: memref<8x32xf32, #tpu.memory_space<vmem>>, %arg3: memref<8x1xf32, #tpu.memory_space<vmem>>, %arg4: memref<1x1xf32, #tpu.memory_space<vmem>>) attributes {dimension_semantics = [#tpu.dimension_semantics<parallel>], iteration_bounds = array<i64: 1>, scalar_prefetch = 0 : i64, scratch_operands = 0 : i64, tpu.core_type = #tpu.core_type<tc>, window_params = [{transform_indices = @transform_0, window_bounds = array<i64: 8, 32>}, {transform_indices = @transform_1, window_bounds = array<i64: 8, 32>}, {transform_indices = @transform_2, window_bounds = array<i64: 8, 1>}, {transform_indices = @transform_3, window_bounds = array<i64: 1, 1>}]} {
    %c0 = arith.constant 0 : index
    %c0_0 = arith.constant 0 : index
    %0 = vector.load %arg1[%c0, %c0_0] : memref<8x32xf32, #tpu.memory_space<vmem>>, vector<8x32xf32>
    %c0_1 = arith.constant 0 : index
    %c0_2 = arith.constant 0 : index
    %1 = vector.load %arg2[%c0_1, %c0_2] : memref<8x32xf32, #tpu.memory_space<vmem>>, vector<8x32xf32>
    %c0_3 = arith.constant 0 : index
    %c0_4 = arith.constant 0 : index
    %2 = vector.load %arg3[%c0_3, %c0_4] : memref<8x1xf32, #tpu.memory_space<vmem>>, vector<8x1xf32>
    %3 = arith.mulf %0, %1 : vector<8x32xf32>
    %cst = arith.constant dense<0.000000e+00> : vector<8xf32>
    %4 = vector.multi_reduction <add>, %3, %cst [1] : vector<8x32xf32> to vector<8xf32>
    %5 = vector.shape_cast %4 : vector<8xf32> to vector<8x1xf32>
    %6 = arith.mulf %0, %0 : vector<8x32xf32>
    %cst_5 = arith.constant dense<0.000000e+00> : vector<8xf32>
    %7 = vector.multi_reduction <add>, %6, %cst_5 [1] : vector<8x32xf32> to vector<8xf32>
    %8 = vector.shape_cast %7 : vector<8xf32> to vector<8x1xf32>
    %9 = arith.mulf %1, %1 : vector<8x32xf32>
    %cst_6 = arith.constant dense<0.000000e+00> : vector<8xf32>
    %10 = vector.multi_reduction <add>, %9, %cst_6 [1] : vector<8x32xf32> to vector<8xf32>
    %11 = vector.shape_cast %10 : vector<8xf32> to vector<8x1xf32>
    %cst_7 = arith.constant 1.000000e-16 : f32
    %12 = vector.broadcast %cst_7 : f32 to vector<8x1xf32>
    %13 = arith.maximumf %8, %12 : vector<8x1xf32>
    %cst_8 = arith.constant 1.000000e-16 : f32
    %14 = vector.broadcast %cst_8 : f32 to vector<8x1xf32>
    %15 = arith.maximumf %11, %14 : vector<8x1xf32>
    %16 = arith.mulf %13, %15 : vector<8x1xf32>
    %17 = math.rsqrt %16 : vector<8x1xf32>
    %18 = arith.mulf %5, %17 : vector<8x1xf32>
    %cst_9 = arith.constant 1.000000e+00 : f32
    %19 = vector.broadcast %cst_9 : f32 to vector<8x1xf32>
    %20 = arith.addf %18, %19 : vector<8x1xf32>
    %cst_10 = arith.constant 5.000000e-01 : f32
    %21 = vector.broadcast %cst_10 : f32 to vector<8x1xf32>
    %22 = arith.mulf %20, %21 : vector<8x1xf32>
    %cst_11 = arith.constant 5.000000e-01 : f32
    %23 = vector.broadcast %cst_11 : f32 to vector<8x1xf32>
    %24 = arith.subf %23, %22 : vector<8x1xf32>
    %cst_12 = arith.constant 0.000000e+00 : f32
    %25 = vector.broadcast %cst_12 : f32 to vector<8x1xf32>
    %26 = arith.maximumf %24, %25 : vector<8x1xf32>
    %27 = arith.mulf %26, %26 : vector<8x1xf32>
    %28 = arith.mulf %2, %27 : vector<8x1xf32>
    %cst_13 = arith.constant 1.000000e+00 : f32
    %29 = vector.broadcast %cst_13 : f32 to vector<8x1xf32>
    %30 = arith.subf %29, %2 : vector<8x1xf32>
    %cst_14 = arith.constant 5.000000e-01 : f32
    %31 = vector.broadcast %cst_14 : f32 to vector<8x1xf32>
    %32 = arith.subf %22, %31 : vector<8x1xf32>
    %cst_15 = arith.constant 0.000000e+00 : f32
    %33 = vector.broadcast %cst_15 : f32 to vector<8x1xf32>
    %34 = arith.maximumf %32, %33 : vector<8x1xf32>
    %35 = arith.mulf %34, %34 : vector<8x1xf32>
    %36 = arith.mulf %30, %35 : vector<8x1xf32>
    %37 = arith.addf %28, %36 : vector<8x1xf32>
    %cst_16 = arith.constant 5.000000e-01 : f32
    %38 = vector.broadcast %cst_16 : f32 to vector<8x1xf32>
    %39 = arith.mulf %38, %37 : vector<8x1xf32>
    %40 = tpu.iota {dimensions = array<i32: 0>} : vector<8x1xi32>
    %c8_i32 = arith.constant 8 : i32
    %41 = arith.muli %arg0, %c8_i32 : i32
    %42 = vector.broadcast %41 : i32 to vector<8x1xi32>
    %43 = arith.addi %42, %40 : vector<8x1xi32>
    %c8_i32_17 = arith.constant 8 : i32
    %44 = vector.broadcast %c8_i32_17 : i32 to vector<8x1xi32>
    %45 = arith.cmpi slt, %43, %44 : vector<8x1xi32>
    %cst_18 = arith.constant 0.000000e+00 : f32
    %46 = vector.broadcast %cst_18 : f32 to vector<8x1xf32>
    %47 = arith.select %45, %39, %46 : vector<8x1xi1>, vector<8x1xf32>
    %48 = vector.shape_cast %47 : vector<8x1xf32> to vector<1x8x1xf32>
    %cst_19 = arith.constant dense<0.000000e+00> : vector<1xf32>
    %49 = vector.multi_reduction <add>, %48, %cst_19 [1, 2] : vector<1x8x1xf32> to vector<1xf32>
    %50 = vector.shape_cast %49 : vector<1xf32> to vector<1x1x1xf32>
    %51 = vector.extract %50[0, 0, 0] : f32 from vector<1x1x1xf32>
    %52 = vector.broadcast %51 : f32 to vector<1x1xf32>
    %c0_20 = arith.constant 0 : index
    %c0_21 = arith.constant 0 : index
    %53 = vector.load %arg4[%c0_20, %c0_21] : memref<1x1xf32, #tpu.memory_space<vmem>>, vector<1x1xf32>
    tpu.vector_store %arg4[%c0_20, %c0_21], %52 {strides = array<i32>} : memref<1x1xf32, #tpu.memory_space<vmem>>, vector<1x1xf32>,
    return
  }
  func.func @transform_0(%arg0: i32) -> (i32, i32) {
    %c0_i32 = arith.constant 0 : i32
    %c0_i32_0 = arith.constant 0 : i32
    return %arg0, %c0_i32 : i32, i32
  }
  func.func @transform_1(%arg0: i32) -> (i32, i32) {
    %c0_i32 = arith.constant 0 : i32
    %c0_i32_0 = arith.constant 0 : i32
    return %arg0, %c0_i32 : i32, i32
  }
  func.func @transform_2(%arg0: i32) -> (i32, i32) {
    %c0_i32 = arith.constant 0 : i32
    %c0_i32_0 = arith.constant 0 : i32
    return %arg0, %c0_i32 : i32, i32
  }
  func.func @transform_3(%arg0: i32) -> (i32, i32) {
    %c0_i32 = arith.constant 0 : i32
    %c0_i32_0 = arith.constant 0 : i32
    return %arg0, %c0_i32 : i32, i32
  }
}

</mosaic_0001>

<bundles_post_ra>
// kernel: tpu_custom_call.1
= control target key start
LH: loop header
LB: loop body
LE: loop exit
PB: predicated region body
PF: predicated region fallthrough
CT: control target
= control target key end

     0   :  { %8 = vsyncpa [#allocation3], 0  ;;  %s182_s0 = inlined_call_operand.vmem [shape: f32[8,32], index: 0, kind: input, shape index: {}]   ;;  %s183_s1 = inlined_call_operand.hbm [shape: f32[8,32], index: 1, kind: input, shape index: {}]   ;;  %s184_s2 = inlined_call_operand.vmem [shape: f32[8,1], index: 2, kind: input, shape index: {}]   ;;  %s185_s3 = inlined_call_operand.hbm [shape: f32[1,1], index: 3, kind: output, shape index: {}]  }
   0x1   :  { %9 = vsyncpa [#allocation4], 0  ;;  %s148_s12 = smov [#allocation2]  }
   0x2   :  { %s18_s13 = sshll.u32 %s148_s12, 4  ;;  %s19_s13 = int_to_ptr.vmem [resolvable:$true] %s18_s13 }
   0x3   :  { %s112_s14 = scalar_lea.vmem %s19_s13, 128  ;;  %p117_p1 = scmp.lt.s32.totalorder %s19_s13, %s19_s13 }
   0x4   :  { %p113_p0 = scmp.ne.s32.totalorder %s19_s13, %s112_s14  ;;  %p118_p2 = scmp.lt.s32.totalorder %s112_s14, %s112_s14 }
   0x6   :  { %p119_p3 = por %p118_p2, %p117_p1 }
   0x8   :  { %p120_p4 = pnand %p119_p3, %p113_p0 }
   0xa   :  { %123 = shalt.err (!%p120_p4)
}
   0xb   :  { %21 = dma.hbm_to_vmem [thread:$0]  %s183_s1, 128, %s19_s13, [#allocation3]  }
   0xc   :  { %144 = dma.done.wait [#allocation3], 128  }
   0xd   :  { %145 = vsyncadd [#allocation3], 4294967168  ;;  %v27_v0 = vld [vmem:[%s182_s0] sm:$0xff]  ;;  %vm31_vm0 = vcmask 261120   ;;  %vm68_vm1 = vcmask 7168   ;;  %vm80_vm2 = vcmask 0  }
   0xe   :  { %v28_v1 = vld [vmem:[#allocation2] sm:$0xff]  ;;  %v35_v2 = vmul.f32 %v27_v0, %v27_v0 }
   0xf   :  { %v39_v3 = vmul.f32 %v28_v1, %v28_v1  ;;  %v30_v4 = vmul.f32 %v28_v1, %v27_v0  ;;  %v29_v18 = vld [vmem:[%s184_s2] sm:$0xff]  ;;  %s149_s2 = smov [#allocation5]  }
  0x10   :  { %v36_v5 = vsel %vm31_vm0, %v35_v2, 0.0  ;;  %v54_v23 = vsub.f32 1.0, %v29_v18  ;;  %s88_s19 = sshll.u32 %s149_s2, 4  ;;  %s89_s19 = int_to_ptr.vmem [resolvable:$true] %s88_s19 }
  0x11   :  { %v32_v6 = vsel %vm31_vm0, %v30_v4, 0.0  ;;  %37 = vadd.xlane.f32.xlu0 %v36_v5  ;;  %v40_v7 = vsel %vm31_vm0, %v39_v3, 0.0  ;;  %s124_s21 = scalar_lea.vmem %s89_s19, 16  ;;  %s128_s22 = scalar_lea.vmem %s89_s19, 32 }
  0x12   :  { %33 = vadd.xlane.f32.xlu1 %v32_v6  ;;  %p125_p5 = scmp.ne.s32.totalorder %s89_s19, %s124_s21  ;;  %p129_p6 = scmp.lt.s32.totalorder %s89_s19, %s89_s19 }
  0x13   :  { %p130_p7 = scmp.lt.s32.totalorder %s128_s22, %s124_s21 }
  0x15   :  { %41 = vadd.xlane.f32.xlu0 %v40_v7  ;;  %p131_p8 = por %p130_p7, %p129_p6 }
  0x17   :  { %p132_p9 = pnand %p131_p8, %p125_p5 }
  0x9a   :  { %v38_v8 = vpop.xlane.xlu0 %37 }
  0x9b   :  { %v43_v10 = vmax.f32 %v38_v8, 1e-16  ;;  %v34_v13 = vpop.xlane.xlu1 %33 }
  0x9e   :  { %v42_v9 = vpop.xlane.xlu0 %41 }
  0x9f   :  { %v44_v11 = vmax.f32 %v42_v9, 1e-16 }
  0xa1   :  { %v45_v12 = vmul.f32 %v44_v11, %v43_v10 }
  0xa3   :  { %102 = vrsqrt.f32 %v45_v12 }
  0xb0   :  { %v103_v14 = vpop.eup %102 }
  0xb1   :  { %v47_v15 = vmul.f32 %v103_v14, %v34_v13 }
  0xb3   :  { %v48_v16 = vadd.f32 1.0, %v47_v15 }
  0xb5   :  { %v49_v17 = vmul.f32 0.5, %v48_v16 }
  0xb7   :  { %v50_v19 = vsub.f32 0.5, %v49_v17  ;;  %v97_v20 = vadd.f32 -0.5, %v49_v17 }
  0xb9   :  { %v51_v21 = vmax.f32 %v50_v19, 0.0  ;;  %v56_v22 = vmax.f32 %v97_v20, 0.0 }
  0xbb   :  { %v52_v24 = vmul.f32 %v51_v21, %v51_v21  ;;  %v57_v25 = vmul.f32 %v56_v22, %v56_v22 }
  0xbd   :  { %v53_v26 = vmul.f32 %v52_v24, %v29_v18  ;;  %v58_v27 = vmul.f32 %v57_v25, %v54_v23 }
  0xbf   :  { %v59_v28 = vadd.f32 %v58_v27, %v53_v26 }
  0xc1   :  { %v60_v29 = vmul.f32 0.5, %v59_v28 }
  0xc3   :  { %v69_v30 = vsel %vm68_vm1, %v60_v29, 0.0 }
  0xc4   :  { %70 = vadd.xlane.f32.xlu1 %v69_v30 }
 0x14d   :  { %v71_v31 = vpop.xlane.xlu1 %70 }
 0x14e   :  { %v72_v32 = vrot.slane %v71_v31, 4 }
 0x150   :  { %v73_v33 = vadd.f32 %v72_v32, %v71_v31 }
 0x152   :  { %v74_v34 = vrot.slane %v73_v33, 2 }
 0x154   :  { %v75_v35 = vadd.f32 %v74_v34, %v73_v33 }
 0x156   :  { %v76_v36 = vrot.slane %v75_v35, 1 }
 0x158   :  { %v77_v37 = vadd.f32 %v76_v36, %v75_v35 }
 0x15a   :  { %98 = vpush %v77_v37 }
 0x18b   :  { %s99_s20 = spop %98 }
 0x18c   :  { %v79_v38 = vstv %s99_s20 }
 0x18d   :  { %81 = vst.msk [vmem:[#allocation5] sm:$0x1] %vm80_vm2, %v79_v38 }
 0x18e   :  { %135 = shalt.err (!%p132_p9)
}
 0x18f   :  { %91 = dma.vmem_to_hbm [thread:$0]  %s89_s19, 16, %s185_s3, [#allocation4]  }
 0x190   :  { %146 = dma.done.wait [#allocation4], 16  }
 0x191   :  { %147 = vsyncadd [#allocation4], 4294967280 }
 0x192   :  { %95 = vsyncpa [#allocation3], 1 }
 0x193   :  { %96 = vsyncpa [#allocation4], 1 }

</bundles_post_ra>
